<compile_context>
chip_gen: v5e
topology: v5e:2x2
jax: 0.10.0
libtpu: 0.0.40
codegen_flags: <defaults>
</compile_context>

<pallas_src>
import math
from functools import partial

import jax
import jax.numpy as jnp
import numpy as np
from jax import lax
from jax.experimental import pallas as pl
from jax.experimental.pallas import tpu as pltpu

# ---- configuration (mirrors args / MoEGate_task defaults) -------------------
EMBED_DIM = 32        # embed_dim
NUM_HEADS = 4         # num_heads
HEAD_DIM = EMBED_DIM // NUM_HEADS
NUM_KEYS = EMBED_DIM  # expert_keys is (embed_dim, embed_dim) -> 32 keys
NUM_EXPERTS = 8       # args.num_experts
TOP_K = 2             # args.top_k
NOISE_EPS = 0.01      # noise_epsilon
NUM_TASK_EMB = 6      # nn.Embedding(6, embed_dim)
TASK_NUM = 3          # args.task_num (size of router_list)

LANES = 128
assert NUM_HEADS * NUM_KEYS == LANES   # stacked-head score layout needs H*S == 128

# ---- packed parameter-slab layout (rows x 128 lanes, f32) --------------------
# every logical block starts at a sublane multiple (8) for clean static slicing
ROW_M1 = 0            # (E, 128)   scale * Wq^T @ K_stacked
ROW_BLK = 32          # (128, 128) block-diag ones (per-head softmax denominators)
ROW_HSUM = 160        # (128, S)   head-average matrix (1/H folded in)
ROW_WGN = 288         # (E, 2*NE)  [Wg^T | Wn^T]
ROW_C1 = 320          # (1, 128)   scale * bq @ K_stacked
ROW_BGN = 328         # (1, 2*NE)  [bg | bn]
ROW_X = 336           # (8, E)     row 0 = task embedding (query), rows 1..7 zero
SLAB_ROWS = 344
assert SLAB_ROWS % 8 == 0 and ROW_X + 8 <= SLAB_ROWS


# ---- kernel body: whole MoEGate_task hot path (per batch tile) ---------------
def _gate_math(slab_ref, noise, gates_ref):
    E, H, NE, S = EMBED_DIM, NUM_HEADS, NUM_EXPERTS, NUM_KEYS
    tb = gates_ref.shape[0]

    # ------ batch-invariant path: runs once per tile on an 8-row block -------
    x8 = slab_ref[ROW_X:ROW_X + 8, 0:E]                 # (8, E); row 0 = query
    m1 = slab_ref[ROW_M1:ROW_M1 + E, :]                 # (E, 128)
    c1 = slab_ref[ROW_C1:ROW_C1 + 1, :]                 # (1, 128)
    blk = slab_ref[ROW_BLK:ROW_BLK + H * S, :]          # (128, 128)
    hsum = slab_ref[ROW_HSUM:ROW_HSUM + H * S, 0:S]     # (128, S)
    wgn = slab_ref[ROW_WGN:ROW_WGN + E, 0:2 * NE]       # (E, 2*NE)
    bgn = slab_ref[ROW_BGN:ROW_BGN + 1, 0:2 * NE]       # (1, 2*NE)

    # all H heads' scaled attention scores in one lane-dense matmul
    s_all = jnp.dot(x8, m1, preferred_element_type=jnp.float32) + c1   # (8, 128)

    # per-head softmax (per-row constant shift is identical per head segment);
    # per-head denominators via block-diag matmul, clamped against 0/0.
    s_all = s_all - jnp.max(s_all, axis=-1, keepdims=True)
    ex = jnp.exp(s_all)
    denom = jnp.dot(ex, blk, preferred_element_type=jnp.float32)
    p = ex / jnp.maximum(denom, 1e-30)

    # average over heads (1/H folded into hsum) -> attention weights over keys
    attn_w = jnp.dot(p, hsum, preferred_element_type=jnp.float32)      # (8, S)

    # expert_weight = softmax(attn_weights): entries are in (0,1], so no
    # max-shift is needed (exp cannot overflow).
    ew = jnp.exp(attn_w)
    ew = ew / jnp.sum(ew, axis=-1, keepdims=True)

    # fused gating + noise linears (one matmul); only row 0 is the real query
    comb = jnp.dot(ew, wgn, preferred_element_type=jnp.float32) + bgn  # (8, 2*NE)
    clean = comb[0:1, 0:NE]                                            # (1, NE)

    # ------ per-row path ------------------------------------------------------
    if noise is None:
        logits = jnp.broadcast_to(clean, (tb, NE))
    else:
        raw = comb[0:1, NE:2 * NE]
        # softplus (beta=1, threshold=20, matching torch.nn.Softplus); the
        # log1p refinement differs by < f32 eps relative to NOISE_EPS here.
        sp = jnp.where(raw > 20.0, raw,
                       jnp.log(1.0 + jnp.exp(jnp.minimum(raw, 20.0))))
        std = sp + NOISE_EPS                                           # (1, NE)
        logits = clean + noise * std                                   # (tb, NE)

    # top-2 selection + softmax over the two + one-hot scatter (first-index
    # tie-breaking, same as torch.topk / scatter), emitted compactly (tb, NE).
    iota = lax.broadcasted_iota(jnp.int32, (tb, NE), 1)
    m_top = jnp.max(logits, axis=1, keepdims=True)
    idx1 = jnp.min(jnp.where(logits == m_top, iota, NE), axis=1, keepdims=True)
    masked = jnp.where(iota == idx1, -jnp.inf, logits)
    m_2nd = jnp.max(masked, axis=1, keepdims=True)
    idx2 = jnp.min(jnp.where(masked == m_2nd, iota, NE), axis=1, keepdims=True)
    e2 = jnp.exp(m_2nd - m_top)
    g1 = 1.0 / (1.0 + e2)
    g2 = e2 * g1
    gates_ref[...] = (g1 * (iota == idx1).astype(jnp.float32)
                      + g2 * (iota == idx2).astype(jnp.float32))


def moe_gate_kernel_train(slab_ref, noise_ref, gates_ref):
    _gate_math(slab_ref, noise_ref[...], gates_ref)


def moe_gate_kernel_eval(slab_ref, gates_ref):
    _gate_math(slab_ref, None, gates_ref)


# ---- parameter init (deterministic, mirrors the module's __init__ shapes) ---
def init_moe_gate_params(key):
    E, NE = EMBED_DIM, NUM_EXPERTS
    ks = jax.random.split(key, 8)
    s = 1.0 / math.sqrt(E)
    return {
        "embed": jax.random.normal(ks[0], (NUM_TASK_EMB, E), jnp.float32),
        # MultiheadAttention in_proj (only Q/K slices are needed)
        "wq": jax.random.uniform(ks[1], (E, E), jnp.float32, -s, s),
        "bq": jnp.zeros((E,), jnp.float32),
        "wk": jax.random.uniform(ks[2], (E, E), jnp.float32, -s, s),
        "bk": jnp.zeros((E,), jnp.float32),
        "expert_keys": jax.random.normal(ks[3], (E, E), jnp.float32),
        "wg": jax.random.uniform(ks[4], (NE, E), jnp.float32, -s, s),
        "bg": jax.random.uniform(ks[5], (NE,), jnp.float32, -s, s),
        "wn": jax.random.uniform(ks[6], (NE, E), jnp.float32, -s, s),
        "bn": jax.random.uniform(ks[7], (NE,), jnp.float32, -s, s),
    }


# ---- init-time parameter folding (numpy; ONE device transfer per task) -------
def _build_task_slab(p, task_id):
    E, H, NE, S, hd = EMBED_DIM, NUM_HEADS, NUM_EXPERTS, NUM_KEYS, HEAD_DIM
    scale = 1.0 / math.sqrt(hd)
    f = lambda a: np.asarray(a, np.float32)
    wq, bq, wk, bk = f(p["wq"]), f(p["bq"]), f(p["wk"]), f(p["bk"])
    keys, embed = f(p["expert_keys"]), f(p["embed"])
    wg, bg, wn, bn = f(p["wg"]), f(p["bg"]), f(p["wn"]), f(p["bn"])

    # batch-independent key projection: k = expert_keys @ Wk^T + bk  (S, E)
    k = keys @ wk.T + bk

    # stacked masked-transposed keys: block h holds k_h^T, other rows zero
    kstack = np.zeros((E, H * S), np.float32)
    for h in range(H):
        kstack[h * hd:(h + 1) * hd, h * S:(h + 1) * S] = k[:, h * hd:(h + 1) * hd].T

    m1 = (wq.T @ kstack) * scale                                  # (E, 128)
    c1 = (bq @ kstack) * scale                                    # (128,)

    seg = np.repeat(np.arange(H), S)
    blk = (seg[:, None] == seg[None, :]).astype(np.float32)       # (128, 128)

    hsum = np.zeros((H * S, S), np.float32)
    hsum[np.arange(H * S), np.tile(np.arange(S), H)] = 1.0 / H    # (128, S)

    wgn = np.concatenate([wg.T, wn.T], axis=1)                    # (E, 2*NE)
    bgn = np.concatenate([bg, bn])                                # (2*NE,)

    slab = np.zeros((SLAB_ROWS, LANES), np.float32)
    slab[ROW_M1:ROW_M1 + E, :] = m1
    slab[ROW_BLK:ROW_BLK + H * S, :] = blk
    slab[ROW_HSUM:ROW_HSUM + H * S, :S] = hsum
    slab[ROW_WGN:ROW_WGN + E, :2 * NE] = wgn
    slab[ROW_C1, :] = c1
    slab[ROW_BGN, :2 * NE] = bgn
    slab[ROW_X, :E] = embed[task_id]      # Router.forward: constant task per call
    return jnp.asarray(slab)


def init_router(key, task_num=TASK_NUM):
    params = [init_moe_gate_params(k) for k in jax.random.split(key, task_num)]
    slabs = [_build_task_slab(p, t) for t, p in enumerate(params)]
    return params, slabs


# ---- wrapper: Router.forward(task_id, bsz, is_train) -------------------------
def _round_up(x, m):
    return ((x + m - 1) // m) * m


@partial(jax.jit, static_argnames=("bsz", "is_train", "tile_rows"))
def _router_forward_impl(slab, noise_key, *, bsz, is_train, tile_rows):
    NE = NUM_EXPERTS
    tb = tile_rows if tile_rows is not None else min(2048, _round_up(bsz, 8))
    tb = _round_up(tb, 8)
    padded = _round_up(bsz, tb)
    grid = (padded // tb,)

    slab_spec = pl.BlockSpec((SLAB_ROWS, LANES), lambda i: (0, 0))   # resident params
    row_spec = pl.BlockSpec((tb, NE), lambda i: (i, 0))              # compact rows
    out_shape = jax.ShapeDtypeStruct((padded, NE), jnp.float32)
    cparams = pltpu.CompilerParams(dimension_semantics=("parallel",))

    if is_train:
        # TODO(synk): noise could be generated in-kernel with pltpu.prng_* to
        # drop the last per-row input DMA; kept host-side so the pure-JAX
        # reference is bit-identical.
        noise = jax.random.normal(noise_key, (bsz, NE), jnp.float32)
        if padded != bsz:
            noise = jnp.pad(noise, ((0, padded - bsz), (0, 0)))
        gates_padded = pl.pallas_call(
            moe_gate_kernel_train,
            out_shape=out_shape,
            grid=grid,
            in_specs=[slab_spec, row_spec],
            out_specs=row_spec,
            compiler_params=cparams,
        )(slab, noise)
    else:
        gates_padded = pl.pallas_call(
            moe_gate_kernel_eval,
            out_shape=out_shape,
            grid=grid,
            in_specs=[slab_spec],
            out_specs=row_spec,
            compiler_params=cparams,
        )(slab)

    gates = gates_padded[:bsz]
    load = gates.sum(0)      # _gates_to_load, done in XLA (correct under padding)
    return gates, load


def router_forward(slabs, task_id, bsz, noise_key=None, is_train=True,
                   tile_rows=None):
    if is_train and noise_key is None:
        raise ValueError("noise_key is required when is_train=True")
    if noise_key is None:
        noise_key = jax.random.PRNGKey(0)   # unused in eval mode
    return _router_forward_impl(slabs[task_id], noise_key, bsz=bsz,
                                is_train=is_train, tile_rows=tile_rows)


# ---- pure-JAX reference (for correctness check only) --------------------------
def moe_gate_reference(p, task_embed, noise=None):
    E, H = EMBED_DIM, NUM_HEADS
    hd = E // H
    q = task_embed @ p["wq"].T + p["bq"]
    k = p["expert_keys"] @ p["wk"].T + p["bk"]
    qh = q.reshape(-1, H, hd)
    kh = k.reshape(-1, H, hd)
    scores = jnp.einsum("nhd,shd->nhs", qh, kh) / math.sqrt(hd)
    attn = jax.nn.softmax(scores, axis=-1)
    attn_w = attn.mean(axis=1)
    ew = jax.nn.softmax(attn_w, axis=-1)
    clean = ew @ p["wg"].T + p["bg"]
    if noise is not None:
        raw = ew @ p["wn"].T + p["bn"]
        std = jax.nn.softplus(raw) + NOISE_EPS
        logits = clean + noise * std
    else:
        logits = clean
    top_vals, top_idx = lax.top_k(logits, TOP_K)
    gk = jax.nn.softmax(top_vals, axis=-1)
    gates = jnp.zeros_like(logits)
    gates = gates.at[jnp.arange(logits.shape[0])[:, None], top_idx].set(gk)
    return gates, gates.sum(0)


if __name__ == "__main__":
    key = jax.random.PRNGKey(0)
    pkey, nkey = jax.random.split(key)

    params, slabs = init_router(pkey, task_num=TASK_NUM)

    # --- case 1: small batch (matches Router.forward usage), single tile -----
    bsz, task_id = 4, 1
    gates, load = router_forward(slabs, task_id, bsz, nkey, is_train=True)
    gates = jax.block_until_ready(gates)
    load = jax.block_until_ready(load)

    p = params[task_id]
    te = p["embed"][jnp.full((bsz,), task_id, jnp.int32)]
    noise = jax.random.normal(nkey, (bsz, NUM_EXPERTS), jnp.float32)
    ref_gates, ref_load = moe_gate_reference(p, te, noise)
    np.testing.assert_allclose(np.asarray(gates), np.asarray(ref_gates),
                               rtol=5e-4, atol=1e-5)
    np.testing.assert_allclose(np.asarray(load), np.asarray(ref_load),
                               rtol=5e-4, atol=1e-5)

    # --- case 2: batch that needs padding + a multi-step grid ----------------
    bsz2, task_id2 = 20, 2
    nkey2 = jax.random.fold_in(nkey, 7)
    gates2, load2 = router_forward(slabs, task_id2, bsz2, nkey2,
                                   is_train=True, tile_rows=8)
    gates2 = jax.block_until_ready(gates2)
    load2 = jax.block_until_ready(load2)

    p2 = params[task_id2]
    te2 = p2["embed"][jnp.full((bsz2,), task_id2, jnp.int32)]
    noise2 = jax.random.normal(nkey2, (bsz2, NUM_EXPERTS), jnp.float32)
    ref_gates2, ref_load2 = moe_gate_reference(p2, te2, noise2)
    np.testing.assert_allclose(np.asarray(gates2), np.asarray(ref_gates2),
                               rtol=5e-4, atol=1e-5)
    np.testing.assert_allclose(np.asarray(load2), np.asarray(ref_load2),
                               rtol=5e-4, atol=1e-5)

    # --- case 3: eval mode (no noise path, no noise DMA) ----------------------
    bsz3, task_id3 = 5, 0
    gates3, load3 = router_forward(slabs, task_id3, bsz3, is_train=False)
    gates3 = jax.block_until_ready(gates3)
    load3 = jax.block_until_ready(load3)

    p3 = params[task_id3]
    te3 = p3["embed"][jnp.full((bsz3,), task_id3, jnp.int32)]
    ref_gates3, ref_load3 = moe_gate_reference(p3, te3, None)
    np.testing.assert_allclose(np.asarray(gates3), np.asarray(ref_gates3),
                               rtol=5e-4, atol=1e-5)
    np.testing.assert_allclose(np.asarray(load3), np.asarray(ref_load3),
                               rtol=5e-4, atol=1e-5)

    print("KERNEL_OK")
</pallas_src>

<mosaic_0001>
module attributes {stable_mosaic.version = 11 : i64} {
  func.func @moe_gate_kernel_train(%arg0: i32, %arg1: memref<344x128xf32, #tpu.memory_space<vmem>>, %arg2: memref<8x8xf32, #tpu.memory_space<vmem>>, %arg3: memref<8x8xf32, #tpu.memory_space<vmem>>) attributes {dimension_semantics = [#tpu.dimension_semantics<parallel>], iteration_bounds = array<i64: 1>, scalar_prefetch = 0 : i64, scratch_operands = 0 : i64, tpu.core_type = #tpu.core_type<tc>, window_params = [{pipeline_mode = #tpu.pipeline_mode<synchronous>, transform_indices = @transform_0, window_bounds = array<i64: 344, 128>}, {transform_indices = @transform_1, window_bounds = array<i64: 8, 8>}, {transform_indices = @transform_2, window_bounds = array<i64: 8, 8>}]} {
    %c0 = arith.constant 0 : index
    %c0_0 = arith.constant 0 : index
    %0 = vector.load %arg2[%c0, %c0_0] : memref<8x8xf32, #tpu.memory_space<vmem>>, vector<8x8xf32>
    %c336 = arith.constant 336 : index
    %c0_1 = arith.constant 0 : index
    %1 = vector.load %arg1[%c336, %c0_1] : memref<344x128xf32, #tpu.memory_space<vmem>>, vector<8x32xf32>
    %c0_2 = arith.constant 0 : index
    %c0_3 = arith.constant 0 : index
    %2 = vector.load %arg1[%c0_2, %c0_3] : memref<344x128xf32, #tpu.memory_space<vmem>>, vector<32x128xf32>
    %c320 = arith.constant 320 : index
    %c0_4 = arith.constant 0 : index
    %3 = vector.load %arg1[%c320, %c0_4] : memref<344x128xf32, #tpu.memory_space<vmem>>, vector<1x128xf32>
    %c32 = arith.constant 32 : index
    %c0_5 = arith.constant 0 : index
    %4 = vector.load %arg1[%c32, %c0_5] : memref<344x128xf32, #tpu.memory_space<vmem>>, vector<128x128xf32>
    %c160 = arith.constant 160 : index
    %c0_6 = arith.constant 0 : index
    %5 = vector.load %arg1[%c160, %c0_6] : memref<344x128xf32, #tpu.memory_space<vmem>>, vector<128x32xf32>
    %c288 = arith.constant 288 : index
    %c0_7 = arith.constant 0 : index
    %6 = vector.load %arg1[%c288, %c0_7] : memref<344x128xf32, #tpu.memory_space<vmem>>, vector<32x16xf32>
    %c328 = arith.constant 328 : index
    %c0_8 = arith.constant 0 : index
    %7 = vector.load %arg1[%c328, %c0_8] : memref<344x128xf32, #tpu.memory_space<vmem>>, vector<1x16xf32>
    %cst = arith.constant dense<0.000000e+00> : vector<8x128xf32>
    %8 = tpu.matmul %1, %2, %cst {dimension_numbers = #tpu.dot_dimension_numbers<[1], [0], [0], [1], [0, 0, 1, 1], [], []>} : vector<8x32xf32>, vector<32x128xf32>, vector<8x128xf32> -> vector<8x128xf32>
    %9 = vector.broadcast %3 : vector<1x128xf32> to vector<8x128xf32>
    %10 = arith.addf %8, %9 : vector<8x128xf32>
    %cst_9 = arith.constant dense<0xFF800000> : vector<8xf32>
    %11 = vector.multi_reduction <maximumf>, %10, %cst_9 [1] : vector<8x128xf32> to vector<8xf32>
    %12 = vector.shape_cast %11 : vector<8xf32> to vector<8x1xf32>
    %13 = vector.broadcast %12 : vector<8x1xf32> to vector<8x128xf32>
    %14 = arith.subf %10, %13 : vector<8x128xf32>
    %15 = math.exp %14 : vector<8x128xf32>
    %cst_10 = arith.constant dense<0.000000e+00> : vector<8x128xf32>
    %16 = tpu.matmul %15, %4, %cst_10 {dimension_numbers = #tpu.dot_dimension_numbers<[1], [0], [0], [1], [0, 0, 1, 1], [], []>} : vector<8x128xf32>, vector<128x128xf32>, vector<8x128xf32> -> vector<8x128xf32>
    %cst_11 = arith.constant 1.000000e-30 : f32
    %17 = vector.broadcast %cst_11 : f32 to vector<8x128xf32>
    %18 = arith.maximumf %16, %17 : vector<8x128xf32>
    %19 = arith.divf %15, %18 : vector<8x128xf32>
    %cst_12 = arith.constant dense<0.000000e+00> : vector<8x32xf32>
    %20 = tpu.matmul %19, %5, %cst_12 {dimension_numbers = #tpu.dot_dimension_numbers<[1], [0], [0], [1], [0, 0, 1, 1], [], []>} : vector<8x128xf32>, vector<128x32xf32>, vector<8x32xf32> -> vector<8x32xf32>
    %21 = math.exp %20 : vector<8x32xf32>
    %cst_13 = arith.constant dense<0.000000e+00> : vector<8xf32>
    %22 = vector.multi_reduction <add>, %21, %cst_13 [1] : vector<8x32xf32> to vector<8xf32>
    %23 = vector.shape_cast %22 : vector<8xf32> to vector<8x1xf32>
    %24 = vector.broadcast %23 : vector<8x1xf32> to vector<8x32xf32>
    %25 = arith.divf %21, %24 : vector<8x32xf32>
    %cst_14 = arith.constant dense<0.000000e+00> : vector<8x16xf32>
    %26 = tpu.matmul %25, %6, %cst_14 {dimension_numbers = #tpu.dot_dimension_numbers<[1], [0], [0], [1], [0, 0, 1, 1], [], []>} : vector<8x32xf32>, vector<32x16xf32>, vector<8x16xf32> -> vector<8x16xf32>
    %27 = vector.broadcast %7 : vector<1x16xf32> to vector<8x16xf32>
    %28 = arith.addf %26, %27 : vector<8x16xf32>
    %29 = vector.extract_strided_slice %28 {offsets = [0, 0], sizes = [1, 8], strides = [1, 1]} : vector<8x16xf32> to vector<1x8xf32>
    %30 = vector.extract_strided_slice %28 {offsets = [0, 8], sizes = [1, 8], strides = [1, 1]} : vector<8x16xf32> to vector<1x8xf32>
    %cst_15 = arith.constant 2.000000e+01 : f32
    %31 = vector.broadcast %cst_15 : f32 to vector<1x8xf32>
    %32 = arith.cmpf ogt, %30, %31 : vector<1x8xf32>
    %cst_16 = arith.constant 2.000000e+01 : f32
    %33 = vector.broadcast %cst_16 : f32 to vector<1x8xf32>
    %34 = arith.minimumf %30, %33 : vector<1x8xf32>
    %35 = math.exp %34 : vector<1x8xf32>
    %cst_17 = arith.constant 1.000000e+00 : f32
    %36 = vector.broadcast %cst_17 : f32 to vector<1x8xf32>
    %37 = arith.addf %36, %35 : vector<1x8xf32>
    %38 = math.log %37 : vector<1x8xf32>
    %39 = arith.select %32, %30, %38 : vector<1x8xi1>, vector<1x8xf32>
    %cst_18 = arith.constant 0.00999999977 : f32
    %40 = vector.broadcast %cst_18 : f32 to vector<1x8xf32>
    %41 = arith.addf %39, %40 : vector<1x8xf32>
    %42 = vector.broadcast %41 : vector<1x8xf32> to vector<8x8xf32>
    %43 = arith.mulf %0, %42 : vector<8x8xf32>
    %44 = vector.broadcast %29 : vector<1x8xf32> to vector<8x8xf32>
    %45 = arith.addf %44, %43 : vector<8x8xf32>
    %46 = tpu.iota {dimensions = array<i32: 1>} : vector<8x8xi32>
    %cst_19 = arith.constant dense<0xFF800000> : vector<8xf32>
    %47 = vector.multi_reduction <maximumf>, %45, %cst_19 [1] : vector<8x8xf32> to vector<8xf32>
    %48 = vector.shape_cast %47 : vector<8xf32> to vector<8x1xf32>
    %49 = vector.broadcast %48 : vector<8x1xf32> to vector<8x8xf32>
    %50 = arith.cmpf oeq, %45, %49 : vector<8x8xf32>
    %c8_i32 = arith.constant 8 : i32
    %51 = vector.broadcast %c8_i32 : i32 to vector<8x8xi32>
    %52 = arith.select %50, %46, %51 : vector<8x8xi1>, vector<8x8xi32>
    %cst_20 = arith.constant dense<2147483647> : vector<8xi32>
    %53 = vector.multi_reduction <minsi>, %52, %cst_20 [1] : vector<8x8xi32> to vector<8xi32>
    %54 = vector.shape_cast %53 : vector<8xi32> to vector<8x1xi32>
    %55 = vector.broadcast %54 : vector<8x1xi32> to vector<8x8xi32>
    %56 = arith.cmpi eq, %46, %55 : vector<8x8xi32>
    %cst_21 = arith.constant 0xFF800000 : f32
    %57 = vector.broadcast %cst_21 : f32 to vector<8x8xf32>
    %58 = arith.select %56, %57, %45 : vector<8x8xi1>, vector<8x8xf32>
    %cst_22 = arith.constant dense<0xFF800000> : vector<8xf32>
    %59 = vector.multi_reduction <maximumf>, %58, %cst_22 [1] : vector<8x8xf32> to vector<8xf32>
    %60 = vector.shape_cast %59 : vector<8xf32> to vector<8x1xf32>
    %61 = vector.broadcast %60 : vector<8x1xf32> to vector<8x8xf32>
    %62 = arith.cmpf oeq, %58, %61 : vector<8x8xf32>
    %c8_i32_23 = arith.constant 8 : i32
    %63 = vector.broadcast %c8_i32_23 : i32 to vector<8x8xi32>
    %64 = arith.select %62, %46, %63 : vector<8x8xi1>, vector<8x8xi32>
    %cst_24 = arith.constant dense<2147483647> : vector<8xi32>
    %65 = vector.multi_reduction <minsi>, %64, %cst_24 [1] : vector<8x8xi32> to vector<8xi32>
    %66 = vector.shape_cast %65 : vector<8xi32> to vector<8x1xi32>
    %67 = arith.subf %60, %48 : vector<8x1xf32>
    %68 = math.exp %67 : vector<8x1xf32>
    %cst_25 = arith.constant 1.000000e+00 : f32
    %69 = vector.broadcast %cst_25 : f32 to vector<8x1xf32>
    %70 = arith.addf %69, %68 : vector<8x1xf32>
    %cst_26 = arith.constant 1.000000e+00 : f32
    %71 = vector.broadcast %cst_26 : f32 to vector<8x1xf32>
    %72 = arith.divf %71, %70 : vector<8x1xf32>
    %73 = arith.mulf %68, %72 : vector<8x1xf32>
    %74 = vector.broadcast %54 : vector<8x1xi32> to vector<8x8xi32>
    %75 = arith.cmpi eq, %46, %74 : vector<8x8xi32>
    %76 = arith.extui %75 : vector<8x8xi1> to vector<8x8xi32>
    %77 = arith.sitofp %76 : vector<8x8xi32> to vector<8x8xf32>
    %78 = vector.broadcast %72 : vector<8x1xf32> to vector<8x8xf32>
    %79 = arith.mulf %78, %77 : vector<8x8xf32>
    %80 = vector.broadcast %66 : vector<8x1xi32> to vector<8x8xi32>
    %81 = arith.cmpi eq, %46, %80 : vector<8x8xi32>
    %82 = arith.extui %81 : vector<8x8xi1> to vector<8x8xi32>
    %83 = arith.sitofp %82 : vector<8x8xi32> to vector<8x8xf32>
    %84 = vector.broadcast %73 : vector<8x1xf32> to vector<8x8xf32>
    %85 = arith.mulf %84, %83 : vector<8x8xf32>
    %86 = arith.addf %79, %85 : vector<8x8xf32>
    %c0_27 = arith.constant 0 : index
    %c0_28 = arith.constant 0 : index
    %87 = vector.load %arg3[%c0_27, %c0_28] : memref<8x8xf32, #tpu.memory_space<vmem>>, vector<8x8xf32>
    tpu.vector_store %arg3[%c0_27, %c0_28], %86 {strides = array<i32>} : memref<8x8xf32, #tpu.memory_space<vmem>>, vector<8x8xf32>,
    return
  }
  func.func @transform_0(%arg0: i32) -> (i32, i32) {
    %c0_i32 = arith.constant 0 : i32
    %c0_i32_0 = arith.constant 0 : i32
    %c0_i32_1 = arith.constant 0 : i32
    return %c0_i32, %c0_i32_0 : i32, i32
  }
  func.func @transform_1(%arg0: i32) -> (i32, i32) {
    %c0_i32 = arith.constant 0 : i32
    %c0_i32_0 = arith.constant 0 : i32
    return %arg0, %c0_i32 : i32, i32
  }
  func.func @transform_2(%arg0: i32) -> (i32, i32) {
    %c0_i32 = arith.constant 0 : i32
    %c0_i32_0 = arith.constant 0 : i32
    return %arg0, %c0_i32 : i32, i32
  }
}

</mosaic_0001>

<bundles_post_ra>
// kernel: _router_forward_impl.1
= control target key start
LH: loop header
LB: loop body
LE: loop exit
PB: predicated region body
PF: predicated region fallthrough
CT: control target
= control target key end

     0   :  { %7 = vsyncpa [#allocation3], 0  ;;  %s350_s12 = smov [#allocation2]   ;;  %s351_s14 = smov 128   ;;  %s397_s0 = inlined_call_operand.hbm [shape: f32[344,128], index: 0, kind: input, shape index: {}]   ;;  %s398_s1 = inlined_call_operand.vmem [shape: f32[8,8], index: 1, kind: input, shape index: {}]   ;;  %s399_s2 = inlined_call_operand.vmem [shape: f32[8,8], index: 2, kind: output, shape index: {}]  }
   0x1   :  { %s12_s11 = sshll.u32 %s397_s0, 4  ;;  %s14_s13 = sshll.u32 %s350_s12, 4  ;;  %s13_s11 = int_to_ptr.hbm [resolvable:$true] %s12_s11  ;;  %s15_s13 = int_to_ptr.vmem [resolvable:$true] %s14_s13 }
   0x2   :  { %s352_s15 = smov 8  }
   0x3   :  { %20 = dma.hbm_to_vmem [thread:$0]  %s13_s11, 5504, %s15_s13, [#allocation3], %s351_s14, %s351_s14, %s352_s15  }
   0x4   :  { %348 = dma.done.wait [#allocation3], 5504  }
   0x5   :  { %349 = vsyncadd [#allocation3], 4294961792  ;;  %v32_v0 = vld [vmem:[#allocation2 + $0x18] sm:$0xff]  ;;  %v31_v1 = vld [vmem:[#allocation2 + $0x10] sm:$0xff]  ;;  %vm72_vm0 = vcmask 261120   ;;  %s353_s0 = smov 120  }
   0x6   :  { %88 = vmatpush.msra.mxu0 %v32_v0  ;;  %v30_v2 = vld [vmem:[#allocation2 + $0x8] sm:$0xff]  ;;  %v29_v3 = vld [vmem:[#allocation2] sm:$0xff]  ;;  %v28_v4 = vld [vmem:[#allocation2 + $0x150] sm:$0xff]  ;;  %vm220_vm10 = vcmask 64512  }
   0x7   :  { %v49_v5 = vld [vmem:[#allocation2 + $0x98] sm:$0xff]  ;;  %v48_v6 = vld [vmem:[#allocation2 + $0x90] sm:$0xff]  ;;  %v47_v7 = vld [vmem:[#allocation2 + $0x88] sm:$0xff] }
   0x8   :  { %89 = vmatpush.msra.mxu0 %v31_v1  ;;  %101 = vmatpush.msra.mxu1 %v49_v5  ;;  %v46_v8 = vld [vmem:[#allocation2 + $0x80] sm:$0xff]  ;;  %v45_v9 = vld [vmem:[#allocation2 + $0x78] sm:$0xff]  ;;  %v44_v10 = vld [vmem:[#allocation2 + $0x70] sm:$0xff] }
   0x9   :  { %v43_v11 = vld [vmem:[#allocation2 + $0x68] sm:$0xff]  ;;  %v42_v12 = vld [vmem:[#allocation2 + $0x60] sm:$0xff]  ;;  %v41_v13 = vld [vmem:[#allocation2 + $0x58] sm:$0xff] }
   0xa   :  { %90 = vmatpush.msra.mxu0 %v30_v2  ;;  %102 = vmatpush.msra.mxu1 %v48_v6  ;;  %v40_v14 = vld [vmem:[#allocation2 + $0x50] sm:$0xff]  ;;  %v306_v15 = vld [vmem:[#allocation2 + $0x140] ss:$0 sm:$0xff]  ;;  %v39_v18 = vld [vmem:[#allocation2 + $0x48] sm:$0xff] }
   0xb   :  { %v38_v19 = vld [vmem:[#allocation2 + $0x40] sm:$0xff]  ;;  %v37_v20 = vld [vmem:[#allocation2 + $0x38] sm:$0xff]  ;;  %v36_v21 = vld [vmem:[#allocation2 + $0x30] sm:$0xff] }
   0xc   :  { %91 = vmatpush.msra.mxu0 %v29_v3  ;;  %103 = vmatpush.msra.mxu1 %v47_v7  ;;  %v35_v22 = vld [vmem:[#allocation2 + $0x28] sm:$0xff]  ;;  %v34_v23 = vld [vmem:[#allocation2 + $0x20] sm:$0xff]  ;;  %v65_v24 = vld [vmem:[#allocation2 + $0x118] sm:$0xff] }
   0xd   :  { %297 = vmatmul.msk.f32.vlgmr.msra.gmra.mxu0 %vm72_vm0, %v28_v4  ;;  %v64_v25 = vld [vmem:[#allocation2 + $0x110] sm:$0xff]  ;;  %137 = vmatpush.msra.mxu2 %v65_v24  ;;  %v63_v26 = vld [vmem:[#allocation2 + $0x108] sm:$0xff]  ;;  %v62_v27 = vld [vmem:[#allocation2 + $0x100] sm:$0xff] }
   0xe   :  { %104 = vmatpush.msra.mxu1 %v46_v8  ;;  %v61_v28 = vld [vmem:[#allocation2 + $0xf8] sm:$0xff]  ;;  %v60_v33 = vld [vmem:[#allocation2 + $0xf0] sm:$0xff]  ;;  %v59_v34 = vld [vmem:[#allocation2 + $0xe8] sm:$0xff] }
   0xf   :  { %138 = vmatpush.msra.mxu2 %v64_v25  ;;  %v58_v35 = vld [vmem:[#allocation2 + $0xe0] sm:$0xff]  ;;  %v57_v36 = vld [vmem:[#allocation2 + $0xd8] sm:$0xff]  ;;  %v56_v37 = vld [vmem:[#allocation2 + $0xd0] sm:$0xff] }
  0x10   :  { %105 = vmatpush.msra.mxu1 %v45_v9  ;;  %v55_v38 = vld [vmem:[#allocation2 + $0xc8] sm:$0xff]  ;;  %v54_v39 = vld [vmem:[#allocation2 + $0xc0] sm:$0xff]  ;;  %v53_v40 = vld [vmem:[#allocation2 + $0xb8] sm:$0xff] }
  0x11   :  { %139 = vmatpush.msra.mxu2 %v63_v26  ;;  %v52_v41 = vld [vmem:[#allocation2 + $0xb0] sm:$0xff]  ;;  %v51_v42 = vld [vmem:[#allocation2 + $0xa8] sm:$0xff]  ;;  %v50_v43 = vld [vmem:[#allocation2 + $0xa0] sm:$0xff] }
  0x12   :  { %106 = vmatpush.msra.mxu1 %v44_v10  ;;  %v69_v61 = vld [vmem:[#allocation2 + $0x138] sm:$0xff]  ;;  %v68_v62 = vld [vmem:[#allocation2 + $0x130] sm:$0xff]  ;;  %v67_v63 = vld [vmem:[#allocation2 + $0x128] sm:$0xff] }
  0x13   :  { %140 = vmatpush.msra.mxu2 %v62_v27  ;;  %193 = vmatpush.msra.mxu3 %v69_v61  ;;  %v66_v0 = vld [vmem:[#allocation2 + $0x120] sm:$0xff] }
  0x14   :  { %107 = vmatpush.msra.mxu1 %v43_v11  ;;  %v27_v25 = vld [vmem:[%s398_s1] sm:$0xff] }
  0x15   :  { %141 = vmatpush.msra.mxu2 %v61_v28  ;;  %194 = vmatpush.msra.mxu3 %v68_v62 }
  0x16   :  { %108 = vmatpush.msra.mxu1 %v42_v12 }
  0x17   :  { %142 = vmatpush.msra.mxu2 %v60_v33  ;;  %195 = vmatpush.msra.mxu3 %v67_v63 }
  0x18   :  { %109 = vmatpush.msra.mxu1 %v41_v13  ;;  %v307_v13 = vld [vmem:[#allocation2 + $0x148] ss:$0 sm:$0xff] }
  0x19   :  { %143 = vmatpush.msra.mxu2 %v59_v34  ;;  %196 = vmatpush.msra.mxu3 %v66_v0 }
  0x1a   :  { %110 = vmatpush.msra.mxu1 %v40_v14 }
  0x1b   :  { %144 = vmatpush.msra.mxu2 %v58_v35 }
  0x1c   :  { %111 = vmatpush.msra.mxu1 %v39_v18 }
  0x1d   :  { %145 = vmatpush.msra.mxu2 %v57_v36 }
  0x1e   :  { %112 = vmatpush.msra.mxu1 %v38_v19 }
  0x1f   :  { %146 = vmatpush.msra.mxu2 %v56_v37 }
  0x20   :  { %113 = vmatpush.msra.mxu1 %v37_v20 }
  0x21   :  { %147 = vmatpush.msra.mxu2 %v55_v38 }
  0x22   :  { %114 = vmatpush.msra.mxu1 %v36_v21 }
  0x23   :  { %148 = vmatpush.msra.mxu2 %v54_v39 }
  0x24   :  { %115 = vmatpush.msra.mxu1 %v35_v22 }
  0x25   :  { %149 = vmatpush.msra.mxu2 %v53_v40 }
  0x26   :  { %116 = vmatpush.msra.mxu1 %v34_v23 }
  0x27   :  { %150 = vmatpush.msra.mxu2 %v52_v41 }
  0x29   :  { %151 = vmatpush.msra.mxu2 %v51_v42 }
  0x2b   :  { %152 = vmatpush.msra.mxu2 %v50_v43 }
  0x8a   :  { %v93_v16 = vpop.f32.mrf.mxu0 }
  0x8b   :  { %v94_v17 = vadd.f32 %v306_v15, %v93_v16 }
  0x8d   :  { %96 = vmax.xlane.f32.xlu0 %v94_v17 }
 0x100   :  { %v97_v29 = vpop.xlane.xlu0 %96 }
 0x101   :  { %v98_v30 = vsub.f32 %v94_v17, %v97_v29 }
 0x103   :  { %v99_v31 = vmul.f32 1.442695, %v98_v30 }
 0x105   :  { %308 = vpow2.f32 %v99_v31  ;;  %v218_v31 = vlaneseq }
 0x10b   :  { %v309_v32 = vpop.eup %308 }
 0x10c   :  { %117 = vmatmul.f32.vlgmr.msra.gmra.mxu1 %v309_v32 }
 0x189   :  { %v118_v44 = vpop.f32.mrf.mxu1 }
 0x18a   :  { %v121_v45 = vmax.f32 %v118_v44, 1e-30 }
 0x18c   :  { %310 = vrcp.f32 %v121_v45  ;;  %v133_v49 = vand.u32 2147483648, %v121_v45  ;;  %v131_v51 = vand.u32 2147483647, %v121_v45  ;;  %vm127_vm2 = vweird.f32 %v121_v45 }
 0x18e   :  { %v134_v53 = vor.u32 1.1754944e-38, %v133_v49  ;;  %vm132_vm4 = vcmp.eq.f32.partialorder %v131_v51, 8.507059e+37 }
 0x192   :  { %v311_v46 = vpop.eup %310 }
 0x193   :  { %v123_v47 = vmul.f32 %v311_v46, %v121_v45  ;;  %vm128_vm1 = vweird.f32 %v311_v46 }
 0x194   :  { %vm129_vm3 = vmor %vm127_vm2, %vm128_vm1 }
 0x195   :  { %v124_v48 = vsub.f32 1.0, %v123_v47 }
 0x197   :  { %v125_v50 = vmul.f32 %v311_v46, %v124_v48 }
 0x199   :  { %v126_v52 = vadd.f32 %v311_v46, %v125_v50 }
 0x19b   :  { %v130_v54 = vsel %vm129_vm3, %v311_v46, %v126_v52 }
 0x19c   :  { %v135_v55 = vsel %vm132_vm4, %v134_v53, %v130_v54 }
 0x19d   :  { %v136_v56 = vmul.f32 %v309_v32, %v135_v55  ;;  %v380_v32 = vand.u32 127, %v218_v31 }
 0x19f   :  { %153 = vmatmul.f32.vlgmr.msra.gmra.mxu2 %v136_v56 }
 0x222   :  { %v154_v57 = vpop.f32.mrf.mxu2 }
 0x223   :  { %v157_v58 = vmul.f32 1.442695, %v154_v57 }
 0x225   :  { %312 = vpow2.f32 %v157_v58 }
 0x22b   :  { %v313_v59 = vpop.eup %312 }
 0x22c   :  { %v159_v60 = vsel %vm72_vm0, %v313_v59, 0.0 }
 0x22d   :  { %160 = vadd.xlane.f32.xlu0 %v159_v60 }
 0x2a0   :  { %v161_v1 = vpop.xlane.xlu0 %160 }
 0x2a1   :  { %314 = vrcp.f32 %v161_v1  ;;  %v173_v5 = vand.u32 2147483648, %v161_v1  ;;  %v171_v7 = vand.u32 2147483647, %v161_v1  ;;  %vm167_vm6 = vweird.f32 %v161_v1 }
 0x2a3   :  { %v174_v9 = vor.u32 1.1754944e-38, %v173_v5  ;;  %vm172_vm8 = vcmp.eq.f32.partialorder %v171_v7, 8.507059e+37 }
 0x2a7   :  { %v315_v2 = vpop.eup %314 }
 0x2a8   :  { %v163_v3 = vmul.f32 %v315_v2, %v161_v1  ;;  %vm168_vm5 = vweird.f32 %v315_v2 }
 0x2a9   :  { %vm169_vm7 = vmor %vm167_vm6, %vm168_vm5 }
 0x2aa   :  { %v164_v4 = vsub.f32 1.0, %v163_v3 }
 0x2ac   :  { %v165_v6 = vmul.f32 %v315_v2, %v164_v4 }
 0x2ae   :  { %v166_v8 = vadd.f32 %v315_v2, %v165_v6 }
 0x2b0   :  { %v170_v10 = vsel %vm169_vm7, %v315_v2, %v166_v8 }
 0x2b1   :  { %v175_v11 = vsel %vm172_vm8, %v174_v9, %v170_v10 }
 0x2b2   :  { %v176_v12 = vmul.f32 %v313_v59, %v175_v11 }
 0x2b4   :  { %298 = vmatmul.msk.f32.vlgmr.msra.gmra.mxu3 %vm72_vm0, %v176_v12 }
 0x337   :  { %v198_v14 = vpop.f32.mrf.mxu3 }
 0x338   :  { %v199_v15 = vadd.f32 %v307_v13, %v198_v14  ;;  %v354_v14 = vmov 0.0  }
 0x33a   :  { %v202_v16 = vmin.f32 %v199_v15, 20.0  ;;  %vm201_vm9 = vcmp.gt.f32.partialorder %v199_v15, 20.0  ;;  %v216_v27 = vperm.slane %v199_v15, 0 }
 0x33c   :  { %v203_v17 = vmul.f32 1.442695, %v202_v16 }
 0x33e   :  { %316 = vpow2.f32 %v203_v17 }
 0x344   :  { %v317_v18 = vpop.eup %316 }
 0x345   :  { %v205_v19 = vadd.f32 1.0, %v317_v18 }
 0x347   :  { %318 = vlog2.f32 %v205_v19 }
 0x34d   :  { %v319_v20 = vpop.eup %318 }
 0x34e   :  { %v207_v21 = vmul.f32 0.6931472, %v319_v20 }
 0x350   :  { %v208_v22 = vsel %vm201_vm9, %v199_v15, %v207_v21 }
 0x351   :  { %v209_v23 = vadd.f32 0.01, %v208_v22 }
 0x353   :  { %v210_v24 = vperm.slane %v209_v23, 0 }
 0x355   :  { %212 = vrot.lane.b32.xlu1 %v210_v24, %s353_s0 }
 0x3c7   :  { %v213_v26 = vpop.permute.xlu1 %212 }
 0x3c8   :  { %v215_v28 = vmul.f32 %v213_v26, %v27_v25 }
 0x3ca   :  { %v217_v29 = vadd.f32 %v216_v27, %v215_v28 }
 0x3cc   :  { %v221_v30 = vsel %vm220_vm10, %v217_v29, -inf }
 0x3cd   :  { %222 = vmax.xlane.f32.xlu1 %v221_v30 }
 0x440   :  { %v223_v33 = vpop.xlane.xlu1 %222 }
 0x441   :  { %vm224_vm11 = vcmp.eq.f32.partialorder %v217_v29, %v223_v33 }
 0x442   :  { %v225_v34 = vsel %vm224_vm11, %v380_v32, 8 }
 0x443   :  { %v226_v35 = vsel %vm220_vm10, %v225_v34, 2147483647 }
 0x444   :  { %v228_v36 = vshra.s32 %v226_v35, 16  ;;  %v227_v38 = vand.u32 65535, %v226_v35 }
 0x446   :  { %v230_v37 = vcvt.s32.f32 %v228_v36  ;;  %v229_v40 = vcvt.s32.f32 %v227_v38 }
 0x448   :  { %231 = vmin.xlane.f32.xlu2 %v230_v37 }
 0x4bb   :  { %v232_v39 = vpop.xlane.xlu2 %231 }
 0x4bc   :  { %vm233_vm12 = vcmp.eq.f32.partialorder %v230_v37, %v232_v39  ;;  %v238_v42 = vcvt.f32.s32 %v232_v39 }
 0x4bd   :  { %v234_v41 = vsel %vm233_vm12, %v229_v40, inf }
 0x4be   :  { %235 = vmin.xlane.f32.xlu2 %v234_v41  ;;  %v239_v44 = vshll.u32 %v238_v42, 16 }
 0x531   :  { %v236_v43 = vpop.xlane.xlu2 %235 }
 0x532   :  { %v237_v45 = vcvt.f32.s32 %v236_v43 }
 0x534   :  { %v240_v46 = vadd.s32 %v239_v44, %v237_v45 }
 0x536   :  { %vm241_vm13 = vcmp.eq.s32.totalorder %v380_v32, %v240_v46 }
 0x537   :  { %v242_v47 = vsel %vm241_vm13, -inf, %v217_v29  ;;  %v299_v15 = vsel %vm241_vm13, 1.0, %v354_v14 }
 0x538   :  { %v243_v48 = vsel %vm220_vm10, %v242_v47, -inf }
 0x539   :  { %244 = vmax.xlane.f32.xlu0 %v243_v48 }
 0x5ac   :  { %v245_v49 = vpop.xlane.xlu0 %244 }
 0x5ad   :  { %vm246_vm14 = vcmp.eq.f32.partialorder %v242_v47, %v245_v49  ;;  %v263_v58 = vsub.f32 %v245_v49, %v223_v33 }
 0x5ae   :  { %v247_v50 = vsel %vm246_vm14, %v380_v32, 8 }
 0x5af   :  { %v248_v51 = vsel %vm220_vm10, %v247_v50, 2147483647  ;;  %v264_v59 = vmul.f32 1.442695, %v263_v58 }
 0x5b0   :  { %v250_v52 = vshra.s32 %v248_v51, 16  ;;  %v249_v54 = vand.u32 65535, %v248_v51 }
 0x5b1   :  { %320 = vpow2.f32 %v264_v59 }
 0x5b2   :  { %v252_v53 = vcvt.s32.f32 %v250_v52  ;;  %v251_v56 = vcvt.s32.f32 %v249_v54 }
 0x5b4   :  { %253 = vmin.xlane.f32.xlu2 %v252_v53 }
 0x5b7   :  { %v321_v60 = vpop.eup %320 }
 0x5b8   :  { %v266_v61 = vadd.f32 1.0, %v321_v60 }
 0x5ba   :  { %322 = vrcp.f32 %v266_v61  ;;  %v278_v3 = vand.u32 2147483648, %v266_v61  ;;  %vm272_vm1 = vweird.f32 %v266_v61  ;;  %v276_v5 = vand.u32 2147483647, %v266_v61 }
 0x5bc   :  { %v279_v7 = vor.u32 1.1754944e-38, %v278_v3  ;;  %vm277_vm3 = vcmp.eq.f32.partialorder %v276_v5, 8.507059e+37 }
 0x5c0   :  { %v323_v62 = vpop.eup %322 }
 0x5c1   :  { %v268_v63 = vmul.f32 %v323_v62, %v266_v61  ;;  %vm273_vm0 = vweird.f32 %v323_v62 }
 0x5c2   :  { %vm274_vm2 = vmor %vm272_vm1, %vm273_vm0 }
 0x5c3   :  { %v269_v0 = vsub.f32 1.0, %v268_v63 }
 0x5c5   :  { %v270_v1 = vmul.f32 %v323_v62, %v269_v0 }
 0x5c7   :  { %v271_v2 = vadd.f32 %v323_v62, %v270_v1 }
 0x5c9   :  { %v275_v6 = vsel %vm274_vm2, %v323_v62, %v271_v2 }
 0x5ca   :  { %v280_v11 = vsel %vm277_vm3, %v279_v7, %v275_v6 }
 0x5cb   :  { %v282_v13 = vmul.f32 %v321_v60, %v280_v11  ;;  %v285_v17 = vmul.f32 %v299_v15, %v280_v11 }
 0x627   :  { %v254_v55 = vpop.xlane.xlu2 %253 }
 0x628   :  { %vm255_vm15 = vcmp.eq.f32.partialorder %v252_v53, %v254_v55  ;;  %v260_v4 = vcvt.f32.s32 %v254_v55 }
 0x629   :  { %v256_v57 = vsel %vm255_vm15, %v251_v56, inf }
 0x62a   :  { %257 = vmin.xlane.f32.xlu0 %v256_v57  ;;  %v261_v9 = vshll.u32 %v260_v4, 16 }
 0x69d   :  { %v258_v8 = vpop.xlane.xlu0 %257 }
 0x69e   :  { %v259_v10 = vcvt.f32.s32 %v258_v8 }
 0x6a0   :  { %v262_v12 = vadd.s32 %v261_v9, %v259_v10 }
 0x6a2   :  { %vm286_vm4 = vcmp.eq.s32.totalorder %v380_v32, %v262_v12 }
 0x6a3   :  { %v300_v16 = vsel %vm286_vm4, 1.0, %v354_v14 }
 0x6a4   :  { %v289_v18 = vmul.f32 %v300_v16, %v282_v13 }
 0x6a6   :  { %v290_v19 = vadd.f32 %v289_v18, %v285_v17 }
 0x6a8   :  { %291 = vst.msk [vmem:[%s399_s2] sm:$0xff] %vm220_vm10, %v290_v19 }
 0x6a9   :  { %296 = vsyncpa [#allocation3], 1 }

</bundles_post_ra>
